<compile_context>
chip_gen: v7x
topology: tpu7x:2x2x1
jax: 0.10.0
libtpu: 0.0.40
codegen_flags: <defaults>
</compile_context>

<pallas_src>
import functools

import jax
import jax.numpy as jnp
from jax.experimental import pallas as pl
from jax.experimental.pallas import tpu as pltpu

EPS = 1e-5
_NUM_SPLITS = 2                      # per-core partial-stat rows (v7x megacore)
_VMEM_LIMIT = 32 * 1024 * 1024       # explicit scoped-VMEM cap, safe on all gens


# ----------------------------- Pallas kernels ------------------------------ #

def _conv_sum_kernel(xcol_ref, w_ref, y_ref, s_ref, ss_ref):
    """One M-tile of conv (single big-K matmul) + per-split sum / sumsq accum."""
    @pl.when(pl.program_id(1) == 0)
    def _():
        s_ref[...] = jnp.zeros_like(s_ref)
        ss_ref[...] = jnp.zeros_like(ss_ref)

    y = jnp.dot(xcol_ref[...], w_ref[...], preferred_element_type=jnp.float32)
    y_ref[...] = y.astype(y_ref.dtype)                 # bf16: halve HBM traffic
    # statistics stay f32 (accumulated from the f32 matmul result)
    s_ref[...] += jnp.sum(y, axis=0, keepdims=True)[None]
    ss_ref[...] += jnp.sum(y * y, axis=0, keepdims=True)[None]


def _bn_relu_kernel(y_ref, a_ref, c_ref, o_ref):
    """o = relu(y * a + c)   (a, c fold BN scale/shift, computed in wrapper)."""
    bn = y_ref[...].astype(jnp.float32) * a_ref[...] + c_ref[...]
    o_ref[...] = jnp.maximum(bn, 0.0).astype(o_ref.dtype)


def _bn_add_relu_kernel(y_ref, a_ref, c_ref, r_ref, o_ref):
    """o = relu(y * a + c + zero_extend(residual))."""
    bn = y_ref[...].astype(jnp.float32) * a_ref[...] + c_ref[...]
    r = r_ref[...].astype(jnp.float32)
    cin = r_ref.shape[-1]
    if cin == o_ref.shape[-1]:
        o_ref[...] = jnp.maximum(bn + r, 0.0).astype(o_ref.dtype)
    else:
        # residual only covers the first cin channels (IdentityPadding zeros
        # the rest): full-width unmasked store, then a narrow masked overwrite.
        o_ref[...] = jnp.maximum(bn, 0.0).astype(o_ref.dtype)
        o_ref[:, :cin] = jnp.maximum(bn[:, :cin] + r, 0.0).astype(o_ref.dtype)


# --------------------------- pallas_call wrappers --------------------------- #

def _conv_sum(xcol, w, tm):
    mp, kp = xcol.shape
    coutp = w.shape[-1]
    steps = mp // tm
    per_split = steps // _NUM_SPLITS
    return pl.pallas_call(
        _conv_sum_kernel,
        out_shape=(
            jax.ShapeDtypeStruct((mp, coutp), jnp.bfloat16),          # conv out
            jax.ShapeDtypeStruct((_NUM_SPLITS, 1, coutp), jnp.float32),  # sum
            jax.ShapeDtypeStruct((_NUM_SPLITS, 1, coutp), jnp.float32),  # sumsq
        ),
        grid=(_NUM_SPLITS, per_split),
        in_specs=[
            pl.BlockSpec((tm, kp), lambda c, i: (c * per_split + i, 0)),
            pl.BlockSpec((kp, coutp), lambda c, i: (0, 0)),   # weights resident
        ],
        out_specs=(
            pl.BlockSpec((tm, coutp), lambda c, i: (c * per_split + i, 0)),
            pl.BlockSpec((1, 1, coutp), lambda c, i: (c, 0, 0)),  # per-split acc
            pl.BlockSpec((1, 1, coutp), lambda c, i: (c, 0, 0)),  # per-split acc
        ),
        compiler_params=pltpu.CompilerParams(
            dimension_semantics=("parallel", "arbitrary"),
            vmem_limit_bytes=_VMEM_LIMIT),
    )(xcol, w)


def _bn_relu(y, a, c, res, tm, out_dtype):
    mp, coutp = y.shape
    vec_spec = pl.BlockSpec((1, coutp), lambda i: (0, 0))
    tile_spec = pl.BlockSpec((tm, coutp), lambda i: (i, 0))
    if res is None:
        kernel, operands = _bn_relu_kernel, (y, a, c)
        in_specs = [tile_spec, vec_spec, vec_spec]
    else:
        kernel, operands = _bn_add_relu_kernel, (y, a, c, res)
        in_specs = [tile_spec, vec_spec, vec_spec,
                    pl.BlockSpec((tm, res.shape[-1]), lambda i: (i, 0))]
    return pl.pallas_call(
        kernel,
        out_shape=jax.ShapeDtypeStruct((mp, coutp), out_dtype),
        grid=(mp // tm,),
        in_specs=in_specs,
        out_specs=tile_spec,
        compiler_params=pltpu.CompilerParams(
            dimension_semantics=("parallel",),            # shard across TCs
            vmem_limit_bytes=_VMEM_LIMIT),
    )(*operands)


# ------------------------------- JAX glue ---------------------------------- #

def _round_up(x, m):
    return (x + m - 1) // m * m


def _choose_tm(m):
    per_split = -(-m // _NUM_SPLITS)                     # ceil(m / splits)
    return min(1024, _round_up(per_split, 16))


def _pad_last(x, target):
    pad = target - x.shape[-1]
    if pad:
        x = jnp.pad(x, ((0, 0),) * (x.ndim - 1) + ((0, pad),))
    return x


def _pad_rows(x, mp):
    m = x.shape[0]
    if mp != m:
        x = jnp.pad(x, ((0, mp - m),) + ((0, 0),) * (x.ndim - 1))
    return x


def _im2col_packed(x_nhwc, stride):
    """3x3 / pad=1 patches packed into the contraction dim: (M, 9*C).

    Runs in the caller's dtype (bf16 here) so the inflated patch tensor only
    crosses HBM at 2 bytes/elem.  TODO(synk): move this in-kernel entirely.
    """
    n, h, w, c = x_nhwc.shape
    ho = (h - 1) // stride + 1
    wo = (w - 1) // stride + 1
    xp = jnp.pad(x_nhwc, ((0, 0), (1, 1), (1, 1), (0, 0)))
    cols = []
    for kh in range(3):
        for kw in range(3):
            cols.append(xp[:, kh:kh + stride * (ho - 1) + 1:stride,
                           kw:kw + stride * (wo - 1) + 1:stride, :])
    xcol = jnp.stack(cols, axis=3)                   # (N, Ho, Wo, 9, C), tap-major
    return xcol.reshape(n * ho * wo, 9 * c), (n, ho, wo)


def _pack_weight(w9, kp, coutp):
    """(9, Cin, Cout) -> zero-padded (Kp, Coutp) bf16."""
    k = w9.shape[0] * w9.shape[1]
    cout = w9.shape[2]
    w = w9.reshape(k, cout)
    w = jnp.pad(w, ((0, kp - k), (0, coutp - cout)))
    return w.astype(jnp.bfloat16)


def _bn_coeffs(s, ss, m, gamma, beta, coutp):
    """Fold training-mode BN (batch stats, biased var) into y*a + c."""
    s = jnp.sum(s, axis=0)                            # reduce per-split partials
    ss = jnp.sum(ss, axis=0)
    mean = s / m
    # NOTE: one-pass E[x^2]-mean^2; fine at this scale / tolerance.
    var = ss / m - mean * mean
    g = _pad_last(gamma, coutp)                       # padded channels: gamma=0
    b = _pad_last(beta, coutp)
    a = g * jax.lax.rsqrt(var + EPS)
    c = b - mean * a
    return a, c


@functools.partial(jax.jit, static_argnums=(2,))
def res_block_forward(x_nchw, params, stride):
    # NCHW -> NHWC, cast to bf16 EARLY so all XLA-side im2col/pad tensors are bf16.
    x = jnp.transpose(x_nchw, (0, 2, 3, 1)).astype(jnp.bfloat16)
    n, h, w_, cin = x.shape
    cout = params["w1"].shape[-1]
    coutp = _round_up(max(cout, 128), 128)           # lane-dense output channels

    # ---- conv1 (stride) + bn1 + relu ----
    xcol1, (n, ho, wo) = _im2col_packed(x, stride)
    m = n * ho * wo
    tm = _choose_tm(m)
    mp = _round_up(m, _NUM_SPLITS * tm)              # zero rows: harmless for stats

    k1p = _round_up(9 * cin, 16)                     # bf16 sublane multiple, not 128
    xcol1 = _pad_rows(_pad_last(xcol1, k1p), mp)
    w1 = _pack_weight(params["w1"], k1p, coutp)
    # conv bias deliberately omitted: it cancels exactly in training-mode BN.

    y1, s1, ss1 = _conv_sum(xcol1, w1, tm)
    a1, c1 = _bn_coeffs(s1, ss1, m, params["g1"], params["beta1"], coutp)
    h1 = _bn_relu(y1, a1, c1, None, tm, jnp.bfloat16)        # bf16: feeds conv2 only
    h1 = h1[:m, :cout].reshape(n, ho, wo, cout)

    # ---- conv2 (stride 1) + bn2 + residual + relu ----
    xcol2, _ = _im2col_packed(h1, 1)
    k2p = _round_up(9 * cout, 16)
    xcol2 = _pad_rows(_pad_last(xcol2, k2p), mp)
    w2 = _pack_weight(params["w2"], k2p, coutp)

    y2, s2, ss2 = _conv_sum(xcol2, w2, tm)
    a2, c2 = _bn_coeffs(s2, ss2, m, params["g2"], params["beta2"], coutp)

    # residual (IdentityPadding: zero-pad channels + MaxPool2d(1, stride));
    # subsample unconditionally, keep TRUE channel count, bf16 (no XLA pad).
    res = x[:, ::stride, ::stride, :].reshape(m, cin)
    res = _pad_rows(res, mp)

    out = _bn_relu(y2, a2, c2, res, tm, jnp.float32)
    out = out[:m, :cout].reshape(n, ho, wo, cout)
    # TODO(synk): drop this transpose if the downstream consumer accepts NHWC.
    return jnp.transpose(out, (0, 3, 1, 2))          # NHWC -> NCHW


def init_params(key, cin, cout):
    k1, k2, k3, k4 = jax.random.split(key, 4)
    return {
        # conv weights stored as (9, Cin, Cout) == (kh*3+kw, Cin, Cout)
        "w1": jax.random.normal(k1, (9, cin, cout), jnp.float32) / jnp.sqrt(9.0 * cin),
        "b1": 0.1 * jax.random.normal(k2, (1, cout), jnp.float32),
        "w2": jax.random.normal(k3, (9, cout, cout), jnp.float32) / jnp.sqrt(9.0 * cout),
        "b2": 0.1 * jax.random.normal(k4, (1, cout), jnp.float32),
        # BatchNorm affine params: PyTorch default init (gamma=1, beta=0)
        "g1": jnp.ones((1, cout), jnp.float32),
        "beta1": jnp.zeros((1, cout), jnp.float32),
        "g2": jnp.ones((1, cout), jnp.float32),
        "beta2": jnp.zeros((1, cout), jnp.float32),
    }


# --------------------------- pure-JAX reference ----------------------------- #

def _reference(x_nchw, params, stride):
    x = jnp.transpose(x_nchw, (0, 2, 3, 1)).astype(jnp.float32)
    cin = x.shape[-1]
    cout = params["w1"].shape[-1]
    w1 = params["w1"].reshape(3, 3, cin, cout)
    w2 = params["w2"].reshape(3, 3, cout, cout)

    def conv(inp, w, b, s):
        y = jax.lax.conv_general_dilated(
            inp, w, (s, s), ((1, 1), (1, 1)),
            dimension_numbers=("NHWC", "HWIO", "NHWC"))
        return y + b.reshape(1, 1, 1, -1)            # bias kept (cancels in BN)

    def bn(y, g, be):
        m = jnp.mean(y, axis=(0, 1, 2), keepdims=True)
        v = jnp.mean((y - m) ** 2, axis=(0, 1, 2), keepdims=True)
        return (y - m) * jax.lax.rsqrt(v + EPS) * g.reshape(1, 1, 1, -1) \
            + be.reshape(1, 1, 1, -1)

    h = jnp.maximum(bn(conv(x, w1, params["b1"], stride),
                       params["g1"], params["beta1"]), 0.0)
    o = bn(conv(h, w2, params["b2"], 1), params["g2"], params["beta2"])
    if cin != cout:
        res = x[:, ::stride, ::stride, :]
        res = jnp.pad(res, ((0, 0), (0, 0), (0, 0), (0, cout - cin)))
    else:
        res = x
    out = jnp.maximum(o + res, 0.0)
    return jnp.transpose(out, (0, 3, 1, 2))


# ---------------------------------- main ------------------------------------ #

if __name__ == "__main__":
    key = jax.random.PRNGKey(0)
    kx, kp = jax.random.split(key)

    N, CIN, COUT, H, W, STRIDE = 2, 4, 8, 16, 16, 2
    x = jax.random.normal(kx, (N, CIN, H, W), jnp.float32)        # NCHW, like PyTorch
    params = init_params(kp, CIN, COUT)

    out = jax.block_until_ready(res_block_forward(x, params, STRIDE))
    ref = jax.block_until_ready(_reference(x, params, STRIDE))

    assert out.shape == (N, COUT, H // STRIDE, W // STRIDE), out.shape
    # tolerance covers bf16 MXU inputs / bf16 intermediates vs f32 XLA reference
    err = float(jnp.max(jnp.abs(out - ref)))
    assert err < 1e-1, err

    print("KERNEL_OK")
</pallas_src>

<mosaic_0001>
module attributes {stable_mosaic.version = 11 : i64} {
  func.func @_bn_relu_kernel(%arg0: i32, %arg1: memref<64x128xbf16, #tpu.memory_space<vmem>>, %arg2: memref<1x128xf32, #tpu.memory_space<vmem>>, %arg3: memref<1x128xf32, #tpu.memory_space<vmem>>, %arg4: memref<64x128xbf16, #tpu.memory_space<vmem>>) attributes {dimension_semantics = [#tpu.dimension_semantics<parallel>], iteration_bounds = array<i64: 2>, scalar_prefetch = 0 : i64, scratch_operands = 0 : i64, tpu.core_type = #tpu.core_type<tc>, window_params = [{transform_indices = @transform_0, window_bounds = array<i64: 64, 128>}, {pipeline_mode = #tpu.pipeline_mode<synchronous>, transform_indices = @transform_1, window_bounds = array<i64: 1, 128>}, {pipeline_mode = #tpu.pipeline_mode<synchronous>, transform_indices = @transform_2, window_bounds = array<i64: 1, 128>}, {transform_indices = @transform_3, window_bounds = array<i64: 64, 128>}]} {
    %c0 = arith.constant 0 : index
    %c0_0 = arith.constant 0 : index
    %0 = vector.load %arg1[%c0, %c0_0] : memref<64x128xbf16, #tpu.memory_space<vmem>>, vector<64x128xbf16>
    %1 = arith.extf %0 : vector<64x128xbf16> to vector<64x128xf32>
    %c0_1 = arith.constant 0 : index
    %c0_2 = arith.constant 0 : index
    %2 = vector.load %arg2[%c0_1, %c0_2] : memref<1x128xf32, #tpu.memory_space<vmem>>, vector<1x128xf32>
    %3 = vector.broadcast %2 : vector<1x128xf32> to vector<64x128xf32>
    %4 = arith.mulf %1, %3 : vector<64x128xf32>
    %c0_3 = arith.constant 0 : index
    %c0_4 = arith.constant 0 : index
    %5 = vector.load %arg3[%c0_3, %c0_4] : memref<1x128xf32, #tpu.memory_space<vmem>>, vector<1x128xf32>
    %6 = vector.broadcast %5 : vector<1x128xf32> to vector<64x128xf32>
    %7 = arith.addf %4, %6 : vector<64x128xf32>
    %cst = arith.constant 0.000000e+00 : f32
    %8 = vector.broadcast %cst : f32 to vector<64x128xf32>
    %9 = arith.maximumf %7, %8 : vector<64x128xf32>
    %10 = arith.truncf %9 : vector<64x128xf32> to vector<64x128xbf16>
    %c0_5 = arith.constant 0 : index
    %c0_6 = arith.constant 0 : index
    %11 = vector.load %arg4[%c0_5, %c0_6] : memref<64x128xbf16, #tpu.memory_space<vmem>>, vector<64x128xbf16>
    tpu.vector_store %arg4[%c0_5, %c0_6], %10 {strides = array<i32>} : memref<64x128xbf16, #tpu.memory_space<vmem>>, vector<64x128xbf16>,
    return
  }
  func.func @transform_0(%arg0: i32) -> (i32, i32) {
    %c0_i32 = arith.constant 0 : i32
    %c0_i32_0 = arith.constant 0 : i32
    return %arg0, %c0_i32 : i32, i32
  }
  func.func @transform_1(%arg0: i32) -> (i32, i32) {
    %c0_i32 = arith.constant 0 : i32
    %c0_i32_0 = arith.constant 0 : i32
    %c0_i32_1 = arith.constant 0 : i32
    return %c0_i32, %c0_i32_0 : i32, i32
  }
  func.func @transform_2(%arg0: i32) -> (i32, i32) {
    %c0_i32 = arith.constant 0 : i32
    %c0_i32_0 = arith.constant 0 : i32
    %c0_i32_1 = arith.constant 0 : i32
    return %c0_i32, %c0_i32_0 : i32, i32
  }
  func.func @transform_3(%arg0: i32) -> (i32, i32) {
    %c0_i32 = arith.constant 0 : i32
    %c0_i32_0 = arith.constant 0 : i32
    return %arg0, %c0_i32 : i32, i32
  }
}

module attributes {stable_mosaic.version = 11 : i64} {
  func.func @_conv_sum_kernel(%arg0: i32, %arg1: i32, %arg2: memref<64x48xbf16, #tpu.memory_space<vmem>>, %arg3: memref<48x128xbf16, #tpu.memory_space<vmem>>, %arg4: memref<64x128xbf16, #tpu.memory_space<vmem>>, %arg5: memref<1x1x128xf32, #tpu.memory_space<vmem>>, %arg6: memref<1x1x128xf32, #tpu.memory_space<vmem>>) attributes {dimension_semantics = [#tpu.dimension_semantics<parallel>, #tpu.dimension_semantics<arbitrary>], iteration_bounds = array<i64: 2, 1>, scalar_prefetch = 0 : i64, scratch_operands = 0 : i64, tpu.core_type = #tpu.core_type<tc>, window_params = [{transform_indices = @transform_0, window_bounds = array<i64: 64, 48>}, {pipeline_mode = #tpu.pipeline_mode<synchronous>, transform_indices = @transform_1, window_bounds = array<i64: 48, 128>}, {transform_indices = @transform_2, window_bounds = array<i64: 64, 128>}, {transform_indices = @transform_3, window_bounds = array<i64: 1, 1, 128>}, {transform_indices = @transform_4, window_bounds = array<i64: 1, 1, 128>}]} {
    %c0_i32 = arith.constant 0 : i32
    %0 = arith.cmpi eq, %arg1, %c0_i32 : i32
    %1 = arith.extui %0 : i1 to i32
    %c0_i32_0 = arith.constant 0 : i32
    %2 = arith.cmpi ne, %1, %c0_i32_0 : i32
    scf.if %2 {
      %cst_20 = arith.constant 0.000000e+00 : f32
      %21 = vector.broadcast %cst_20 : f32 to vector<1x1x128xf32>
      %c0_21 = arith.constant 0 : index
      %c0_22 = arith.constant 0 : index
      %c0_23 = arith.constant 0 : index
      %22 = vector.load %arg5[%c0_21, %c0_22, %c0_23] : memref<1x1x128xf32, #tpu.memory_space<vmem>>, vector<1x1x128xf32>
      tpu.vector_store %arg5[%c0_21, %c0_22, %c0_23], %21 {strides = array<i32>} : memref<1x1x128xf32, #tpu.memory_space<vmem>>, vector<1x1x128xf32>,
      %cst_24 = arith.constant 0.000000e+00 : f32
      %23 = vector.broadcast %cst_24 : f32 to vector<1x1x128xf32>
      %c0_25 = arith.constant 0 : index
      %c0_26 = arith.constant 0 : index
      %c0_27 = arith.constant 0 : index
      %24 = vector.load %arg6[%c0_25, %c0_26, %c0_27] : memref<1x1x128xf32, #tpu.memory_space<vmem>>, vector<1x1x128xf32>
      tpu.vector_store %arg6[%c0_25, %c0_26, %c0_27], %23 {strides = array<i32>} : memref<1x1x128xf32, #tpu.memory_space<vmem>>, vector<1x1x128xf32>,
    } else {
    }
    %c0 = arith.constant 0 : index
    %c0_1 = arith.constant 0 : index
    %3 = vector.load %arg2[%c0, %c0_1] : memref<64x48xbf16, #tpu.memory_space<vmem>>, vector<64x48xbf16>
    %c0_2 = arith.constant 0 : index
    %c0_3 = arith.constant 0 : index
    %4 = vector.load %arg3[%c0_2, %c0_3] : memref<48x128xbf16, #tpu.memory_space<vmem>>, vector<48x128xbf16>
    %cst = arith.constant dense<0.000000e+00> : vector<64x128xf32>
    %5 = tpu.matmul %3, %4, %cst {dimension_numbers = #tpu.dot_dimension_numbers<[1], [0], [0], [1], [0, 0, 1, 1], [], []>} : vector<64x48xbf16>, vector<48x128xbf16>, vector<64x128xf32> -> vector<64x128xf32>
    %6 = arith.truncf %5 : vector<64x128xf32> to vector<64x128xbf16>
    %c0_4 = arith.constant 0 : index
    %c0_5 = arith.constant 0 : index
    %7 = vector.load %arg4[%c0_4, %c0_5] : memref<64x128xbf16, #tpu.memory_space<vmem>>, vector<64x128xbf16>
    tpu.vector_store %arg4[%c0_4, %c0_5], %6 {strides = array<i32>} : memref<64x128xbf16, #tpu.memory_space<vmem>>, vector<64x128xbf16>,
    %c0_6 = arith.constant 0 : index
    %c0_7 = arith.constant 0 : index
    %c0_8 = arith.constant 0 : index
    %8 = vector.load %arg5[%c0_6, %c0_7, %c0_8] : memref<1x1x128xf32, #tpu.memory_space<vmem>>, vector<1x1x128xf32>
    %cst_9 = arith.constant dense<0.000000e+00> : vector<128xf32>
    %9 = vector.multi_reduction <add>, %5, %cst_9 [0] : vector<64x128xf32> to vector<128xf32>
    %10 = vector.shape_cast %9 : vector<128xf32> to vector<1x128xf32>
    %11 = vector.shape_cast %10 : vector<1x128xf32> to vector<1x1x128xf32>
    %12 = arith.addf %8, %11 : vector<1x1x128xf32>
    %c0_10 = arith.constant 0 : index
    %c0_11 = arith.constant 0 : index
    %c0_12 = arith.constant 0 : index
    %13 = vector.load %arg5[%c0_10, %c0_11, %c0_12] : memref<1x1x128xf32, #tpu.memory_space<vmem>>, vector<1x1x128xf32>
    tpu.vector_store %arg5[%c0_10, %c0_11, %c0_12], %12 {strides = array<i32>} : memref<1x1x128xf32, #tpu.memory_space<vmem>>, vector<1x1x128xf32>,
    %c0_13 = arith.constant 0 : index
    %c0_14 = arith.constant 0 : index
    %c0_15 = arith.constant 0 : index
    %14 = vector.load %arg6[%c0_13, %c0_14, %c0_15] : memref<1x1x128xf32, #tpu.memory_space<vmem>>, vector<1x1x128xf32>
    %15 = arith.mulf %5, %5 : vector<64x128xf32>
    %cst_16 = arith.constant dense<0.000000e+00> : vector<128xf32>
    %16 = vector.multi_reduction <add>, %15, %cst_16 [0] : vector<64x128xf32> to vector<128xf32>
    %17 = vector.shape_cast %16 : vector<128xf32> to vector<1x128xf32>
    %18 = vector.shape_cast %17 : vector<1x128xf32> to vector<1x1x128xf32>
    %19 = arith.addf %14, %18 : vector<1x1x128xf32>
    %c0_17 = arith.constant 0 : index
    %c0_18 = arith.constant 0 : index
    %c0_19 = arith.constant 0 : index
    %20 = vector.load %arg6[%c0_17, %c0_18, %c0_19] : memref<1x1x128xf32, #tpu.memory_space<vmem>>, vector<1x1x128xf32>
    tpu.vector_store %arg6[%c0_17, %c0_18, %c0_19], %19 {strides = array<i32>} : memref<1x1x128xf32, #tpu.memory_space<vmem>>, vector<1x1x128xf32>,
    return
  }
  func.func @transform_0(%arg0: i32, %arg1: i32) -> (i32, i32) {
    %c1_i32 = arith.constant 1 : i32
    %0 = arith.muli %arg0, %c1_i32 : i32
    %1 = arith.addi %0, %arg1 : i32
    %c0_i32 = arith.constant 0 : i32
    %c0_i32_0 = arith.constant 0 : i32
    return %1, %c0_i32 : i32, i32
  }
  func.func @transform_1(%arg0: i32, %arg1: i32) -> (i32, i32) {
    %c0_i32 = arith.constant 0 : i32
    %c0_i32_0 = arith.constant 0 : i32
    %c0_i32_1 = arith.constant 0 : i32
    return %c0_i32, %c0_i32_0 : i32, i32
  }
  func.func @transform_2(%arg0: i32, %arg1: i32) -> (i32, i32) {
    %c1_i32 = arith.constant 1 : i32
    %0 = arith.muli %arg0, %c1_i32 : i32
    %1 = arith.addi %0, %arg1 : i32
    %c0_i32 = arith.constant 0 : i32
    %c0_i32_0 = arith.constant 0 : i32
    return %1, %c0_i32 : i32, i32
  }
  func.func @transform_3(%arg0: i32, %arg1: i32) -> (i32, i32, i32) {
    %c0_i32 = arith.constant 0 : i32
    %c0_i32_0 = arith.constant 0 : i32
    %c0_i32_1 = arith.constant 0 : i32
    return %arg0, %c0_i32, %c0_i32_0 : i32, i32, i32
  }
  func.func @transform_4(%arg0: i32, %arg1: i32) -> (i32, i32, i32) {
    %c0_i32 = arith.constant 0 : i32
    %c0_i32_0 = arith.constant 0 : i32
    %c0_i32_1 = arith.constant 0 : i32
    return %arg0, %c0_i32, %c0_i32_0 : i32, i32, i32
  }
}

module attributes {stable_mosaic.version = 11 : i64} {
  func.func @_conv_sum_kernel(%arg0: i32, %arg1: i32, %arg2: memref<64x80xbf16, #tpu.memory_space<vmem>>, %arg3: memref<80x128xbf16, #tpu.memory_space<vmem>>, %arg4: memref<64x128xbf16, #tpu.memory_space<vmem>>, %arg5: memref<1x1x128xf32, #tpu.memory_space<vmem>>, %arg6: memref<1x1x128xf32, #tpu.memory_space<vmem>>) attributes {dimension_semantics = [#tpu.dimension_semantics<parallel>, #tpu.dimension_semantics<arbitrary>], iteration_bounds = array<i64: 2, 1>, scalar_prefetch = 0 : i64, scratch_operands = 0 : i64, tpu.core_type = #tpu.core_type<tc>, window_params = [{transform_indices = @transform_0, window_bounds = array<i64: 64, 80>}, {pipeline_mode = #tpu.pipeline_mode<synchronous>, transform_indices = @transform_1, window_bounds = array<i64: 80, 128>}, {transform_indices = @transform_2, window_bounds = array<i64: 64, 128>}, {transform_indices = @transform_3, window_bounds = array<i64: 1, 1, 128>}, {transform_indices = @transform_4, window_bounds = array<i64: 1, 1, 128>}]} {
    %c0_i32 = arith.constant 0 : i32
    %0 = arith.cmpi eq, %arg1, %c0_i32 : i32
    %1 = arith.extui %0 : i1 to i32
    %c0_i32_0 = arith.constant 0 : i32
    %2 = arith.cmpi ne, %1, %c0_i32_0 : i32
    scf.if %2 {
      %cst_20 = arith.constant 0.000000e+00 : f32
      %21 = vector.broadcast %cst_20 : f32 to vector<1x1x128xf32>
      %c0_21 = arith.constant 0 : index
      %c0_22 = arith.constant 0 : index
      %c0_23 = arith.constant 0 : index
      %22 = vector.load %arg5[%c0_21, %c0_22, %c0_23] : memref<1x1x128xf32, #tpu.memory_space<vmem>>, vector<1x1x128xf32>
      tpu.vector_store %arg5[%c0_21, %c0_22, %c0_23], %21 {strides = array<i32>} : memref<1x1x128xf32, #tpu.memory_space<vmem>>, vector<1x1x128xf32>,
      %cst_24 = arith.constant 0.000000e+00 : f32
      %23 = vector.broadcast %cst_24 : f32 to vector<1x1x128xf32>
      %c0_25 = arith.constant 0 : index
      %c0_26 = arith.constant 0 : index
      %c0_27 = arith.constant 0 : index
      %24 = vector.load %arg6[%c0_25, %c0_26, %c0_27] : memref<1x1x128xf32, #tpu.memory_space<vmem>>, vector<1x1x128xf32>
      tpu.vector_store %arg6[%c0_25, %c0_26, %c0_27], %23 {strides = array<i32>} : memref<1x1x128xf32, #tpu.memory_space<vmem>>, vector<1x1x128xf32>,
    } else {
    }
    %c0 = arith.constant 0 : index
    %c0_1 = arith.constant 0 : index
    %3 = vector.load %arg2[%c0, %c0_1] : memref<64x80xbf16, #tpu.memory_space<vmem>>, vector<64x80xbf16>
    %c0_2 = arith.constant 0 : index
    %c0_3 = arith.constant 0 : index
    %4 = vector.load %arg3[%c0_2, %c0_3] : memref<80x128xbf16, #tpu.memory_space<vmem>>, vector<80x128xbf16>
    %cst = arith.constant dense<0.000000e+00> : vector<64x128xf32>
    %5 = tpu.matmul %3, %4, %cst {dimension_numbers = #tpu.dot_dimension_numbers<[1], [0], [0], [1], [0, 0, 1, 1], [], []>} : vector<64x80xbf16>, vector<80x128xbf16>, vector<64x128xf32> -> vector<64x128xf32>
    %6 = arith.truncf %5 : vector<64x128xf32> to vector<64x128xbf16>
    %c0_4 = arith.constant 0 : index
    %c0_5 = arith.constant 0 : index
    %7 = vector.load %arg4[%c0_4, %c0_5] : memref<64x128xbf16, #tpu.memory_space<vmem>>, vector<64x128xbf16>
    tpu.vector_store %arg4[%c0_4, %c0_5], %6 {strides = array<i32>} : memref<64x128xbf16, #tpu.memory_space<vmem>>, vector<64x128xbf16>,
    %c0_6 = arith.constant 0 : index
    %c0_7 = arith.constant 0 : index
    %c0_8 = arith.constant 0 : index
    %8 = vector.load %arg5[%c0_6, %c0_7, %c0_8] : memref<1x1x128xf32, #tpu.memory_space<vmem>>, vector<1x1x128xf32>
    %cst_9 = arith.constant dense<0.000000e+00> : vector<128xf32>
    %9 = vector.multi_reduction <add>, %5, %cst_9 [0] : vector<64x128xf32> to vector<128xf32>
    %10 = vector.shape_cast %9 : vector<128xf32> to vector<1x128xf32>
    %11 = vector.shape_cast %10 : vector<1x128xf32> to vector<1x1x128xf32>
    %12 = arith.addf %8, %11 : vector<1x1x128xf32>
    %c0_10 = arith.constant 0 : index
    %c0_11 = arith.constant 0 : index
    %c0_12 = arith.constant 0 : index
    %13 = vector.load %arg5[%c0_10, %c0_11, %c0_12] : memref<1x1x128xf32, #tpu.memory_space<vmem>>, vector<1x1x128xf32>
    tpu.vector_store %arg5[%c0_10, %c0_11, %c0_12], %12 {strides = array<i32>} : memref<1x1x128xf32, #tpu.memory_space<vmem>>, vector<1x1x128xf32>,
    %c0_13 = arith.constant 0 : index
    %c0_14 = arith.constant 0 : index
    %c0_15 = arith.constant 0 : index
    %14 = vector.load %arg6[%c0_13, %c0_14, %c0_15] : memref<1x1x128xf32, #tpu.memory_space<vmem>>, vector<1x1x128xf32>
    %15 = arith.mulf %5, %5 : vector<64x128xf32>
    %cst_16 = arith.constant dense<0.000000e+00> : vector<128xf32>
    %16 = vector.multi_reduction <add>, %15, %cst_16 [0] : vector<64x128xf32> to vector<128xf32>
    %17 = vector.shape_cast %16 : vector<128xf32> to vector<1x128xf32>
    %18 = vector.shape_cast %17 : vector<1x128xf32> to vector<1x1x128xf32>
    %19 = arith.addf %14, %18 : vector<1x1x128xf32>
    %c0_17 = arith.constant 0 : index
    %c0_18 = arith.constant 0 : index
    %c0_19 = arith.constant 0 : index
    %20 = vector.load %arg6[%c0_17, %c0_18, %c0_19] : memref<1x1x128xf32, #tpu.memory_space<vmem>>, vector<1x1x128xf32>
    tpu.vector_store %arg6[%c0_17, %c0_18, %c0_19], %19 {strides = array<i32>} : memref<1x1x128xf32, #tpu.memory_space<vmem>>, vector<1x1x128xf32>,
    return
  }
  func.func @transform_0(%arg0: i32, %arg1: i32) -> (i32, i32) {
    %c1_i32 = arith.constant 1 : i32
    %0 = arith.muli %arg0, %c1_i32 : i32
    %1 = arith.addi %0, %arg1 : i32
    %c0_i32 = arith.constant 0 : i32
    %c0_i32_0 = arith.constant 0 : i32
    return %1, %c0_i32 : i32, i32
  }
  func.func @transform_1(%arg0: i32, %arg1: i32) -> (i32, i32) {
    %c0_i32 = arith.constant 0 : i32
    %c0_i32_0 = arith.constant 0 : i32
    %c0_i32_1 = arith.constant 0 : i32
    return %c0_i32, %c0_i32_0 : i32, i32
  }
  func.func @transform_2(%arg0: i32, %arg1: i32) -> (i32, i32) {
    %c1_i32 = arith.constant 1 : i32
    %0 = arith.muli %arg0, %c1_i32 : i32
    %1 = arith.addi %0, %arg1 : i32
    %c0_i32 = arith.constant 0 : i32
    %c0_i32_0 = arith.constant 0 : i32
    return %1, %c0_i32 : i32, i32
  }
  func.func @transform_3(%arg0: i32, %arg1: i32) -> (i32, i32, i32) {
    %c0_i32 = arith.constant 0 : i32
    %c0_i32_0 = arith.constant 0 : i32
    %c0_i32_1 = arith.constant 0 : i32
    return %arg0, %c0_i32, %c0_i32_0 : i32, i32, i32
  }
  func.func @transform_4(%arg0: i32, %arg1: i32) -> (i32, i32, i32) {
    %c0_i32 = arith.constant 0 : i32
    %c0_i32_0 = arith.constant 0 : i32
    %c0_i32_1 = arith.constant 0 : i32
    return %arg0, %c0_i32, %c0_i32_0 : i32, i32, i32
  }
}

module attributes {stable_mosaic.version = 11 : i64} {
  func.func @_bn_add_relu_kernel(%arg0: i32, %arg1: memref<64x128xbf16, #tpu.memory_space<vmem>>, %arg2: memref<1x128xf32, #tpu.memory_space<vmem>>, %arg3: memref<1x128xf32, #tpu.memory_space<vmem>>, %arg4: memref<64x4xbf16, #tpu.memory_space<vmem>>, %arg5: memref<64x128xf32, #tpu.memory_space<vmem>>) attributes {dimension_semantics = [#tpu.dimension_semantics<parallel>], iteration_bounds = array<i64: 2>, scalar_prefetch = 0 : i64, scratch_operands = 0 : i64, tpu.core_type = #tpu.core_type<tc>, window_params = [{transform_indices = @transform_0, window_bounds = array<i64: 64, 128>}, {pipeline_mode = #tpu.pipeline_mode<synchronous>, transform_indices = @transform_1, window_bounds = array<i64: 1, 128>}, {pipeline_mode = #tpu.pipeline_mode<synchronous>, transform_indices = @transform_2, window_bounds = array<i64: 1, 128>}, {transform_indices = @transform_3, window_bounds = array<i64: 64, 4>}, {transform_indices = @transform_4, window_bounds = array<i64: 64, 128>}]} {
    %c0 = arith.constant 0 : index
    %c0_0 = arith.constant 0 : index
    %0 = vector.load %arg1[%c0, %c0_0] : memref<64x128xbf16, #tpu.memory_space<vmem>>, vector<64x128xbf16>
    %1 = arith.extf %0 : vector<64x128xbf16> to vector<64x128xf32>
    %c0_1 = arith.constant 0 : index
    %c0_2 = arith.constant 0 : index
    %2 = vector.load %arg2[%c0_1, %c0_2] : memref<1x128xf32, #tpu.memory_space<vmem>>, vector<1x128xf32>
    %3 = vector.broadcast %2 : vector<1x128xf32> to vector<64x128xf32>
    %4 = arith.mulf %1, %3 : vector<64x128xf32>
    %c0_3 = arith.constant 0 : index
    %c0_4 = arith.constant 0 : index
    %5 = vector.load %arg3[%c0_3, %c0_4] : memref<1x128xf32, #tpu.memory_space<vmem>>, vector<1x128xf32>
    %6 = vector.broadcast %5 : vector<1x128xf32> to vector<64x128xf32>
    %7 = arith.addf %4, %6 : vector<64x128xf32>
    %c0_5 = arith.constant 0 : index
    %c0_6 = arith.constant 0 : index
    %8 = vector.load %arg4[%c0_5, %c0_6] : memref<64x4xbf16, #tpu.memory_space<vmem>>, vector<64x4xbf16>
    %9 = arith.extf %8 : vector<64x4xbf16> to vector<64x4xf32>
    %cst = arith.constant 0.000000e+00 : f32
    %10 = vector.broadcast %cst : f32 to vector<64x128xf32>
    %11 = arith.maximumf %7, %10 : vector<64x128xf32>
    %c0_7 = arith.constant 0 : index
    %c0_8 = arith.constant 0 : index
    %12 = vector.load %arg5[%c0_7, %c0_8] : memref<64x128xf32, #tpu.memory_space<vmem>>, vector<64x128xf32>
    tpu.vector_store %arg5[%c0_7, %c0_8], %11 {strides = array<i32>} : memref<64x128xf32, #tpu.memory_space<vmem>>, vector<64x128xf32>,
    %13 = vector.extract_strided_slice %7 {offsets = [0, 0], sizes = [64, 4], strides = [1, 1]} : vector<64x128xf32> to vector<64x4xf32>
    %14 = arith.addf %13, %9 : vector<64x4xf32>
    %cst_9 = arith.constant 0.000000e+00 : f32
    %15 = vector.broadcast %cst_9 : f32 to vector<64x4xf32>
    %16 = arith.maximumf %14, %15 : vector<64x4xf32>
    %c0_10 = arith.constant 0 : index
    %c0_11 = arith.constant 0 : index
    %17 = vector.load %arg5[%c0_10, %c0_11] : memref<64x128xf32, #tpu.memory_space<vmem>>, vector<64x4xf32>
    tpu.vector_store %arg5[%c0_10, %c0_11], %16 {strides = array<i32>} : memref<64x128xf32, #tpu.memory_space<vmem>>, vector<64x4xf32>,
    return
  }
  func.func @transform_0(%arg0: i32) -> (i32, i32) {
    %c0_i32 = arith.constant 0 : i32
    %c0_i32_0 = arith.constant 0 : i32
    return %arg0, %c0_i32 : i32, i32
  }
  func.func @transform_1(%arg0: i32) -> (i32, i32) {
    %c0_i32 = arith.constant 0 : i32
    %c0_i32_0 = arith.constant 0 : i32
    %c0_i32_1 = arith.constant 0 : i32
    return %c0_i32, %c0_i32_0 : i32, i32
  }
  func.func @transform_2(%arg0: i32) -> (i32, i32) {
    %c0_i32 = arith.constant 0 : i32
    %c0_i32_0 = arith.constant 0 : i32
    %c0_i32_1 = arith.constant 0 : i32
    return %c0_i32, %c0_i32_0 : i32, i32
  }
  func.func @transform_3(%arg0: i32) -> (i32, i32) {
    %c0_i32 = arith.constant 0 : i32
    %c0_i32_0 = arith.constant 0 : i32
    return %arg0, %c0_i32 : i32, i32
  }
  func.func @transform_4(%arg0: i32) -> (i32, i32) {
    %c0_i32 = arith.constant 0 : i32
    %c0_i32_0 = arith.constant 0 : i32
    return %arg0, %c0_i32 : i32, i32
  }
}

</mosaic_0001>

<bundles_post_ra>
// kernel: res_block_forward.5
= control target key start
LH: loop header
LB: loop body
LE: loop exit
PB: predicated region body
PF: predicated region fallthrough
CT: control target
= control target key end

     0   :  { %s431_s12 = smov 0   ;;  %s461_s0 = inlined_call_operand.vmem [shape: bf16[128,128], index: 0, kind: input, shape index: {}]   ;;  %s462_s1 = inlined_call_operand.vmem [shape: f32[1,128], index: 1, kind: input, shape index: {}]   ;;  %s463_s2 = inlined_call_operand.vmem [shape: f32[1,128], index: 2, kind: input, shape index: {}]   ;;  %s464_s3 = inlined_call_operand.vmem [shape: bf16[128,128], index: 3, kind: output, shape index: {}]  }
   0x1 LB: > { %s324_s13 = sadd.s32 4294967295, %s409_s12   ;;  %p328_p0 = scmp.ge.s32.totalorder %s409_s12, 1  ;;  %s409_s12 = sphi %s431_s12, %s13_s12  }
   0x2   : > { %p138_p1 = scmp.lt.s32.totalorder %s409_s12, 3 }
   0x4   : > { %p139_p2 = pnand %p328_p0, %p138_p1 }
   0x5   : > { %s329_s14 = sshll.u32 (!%p139_p2), %s324_s13, 3  ;;  %v333_v0 = vld [vmem:[%s462_s1] ss:$0 sm:$0xff] (!%p139_p2) }
   0x6   : > { %142 = sbr.rel (%p139_p2) target bundleno = 29 (0x1d), region = 32  ;;  %p163_p3 = scmp.lt.s32.totalorder (!%p139_p2), %s329_s14, 15  ;;  %v334_v9 = vld [vmem:[%s463_s2] ss:$0 sm:$0xff] (!%p139_p2) }
   0xd   : > { %s466_s14 = smov (!%p163_p3, %s329_s14), 15 }
   0xe   : > { %s330_s15 = sshll.u32 %s466_s14, 2 }
   0xf   : > { %s166_s18 = scalar_lea.vmem %s461_s0, %s330_s15  ;;  %s172_s25 = scalar_lea.vmem %s464_s3, %s330_s15 }
  0x10   : > { %v354_v1 = vld [vmem:[%s166_s18] sm:$0xff]   ;;  %v389_v2 = vld [vmem:[%s166_s18 + $0x8] sm:$0xff]   ;;  %v390_v3 = vld [vmem:[%s166_s18 + $0x10] sm:$0xff]  }
  0x11   : > { %v355_v4 = vunpack.c.l.bf16 %v354_v1  ;;  %v356_v5 = vunpack.c.h.bf16 %v354_v1  ;;  %v359_v6 = vunpack.c.l.bf16 %v389_v2  ;;  %v360_v7 = vunpack.c.h.bf16 %v389_v2  ;;  %v391_v8 = vld [vmem:[%s166_s18 + $0x18] sm:$0xff]  }
  0x12   : > { %v363_v10 = vunpack.c.l.bf16 %v390_v3  ;;  %v364_v11 = vunpack.c.h.bf16 %v390_v3  ;;  %v367_v12 = vunpack.c.l.bf16 %v391_v8  ;;  %v368_v13 = vunpack.c.h.bf16 %v391_v8 }
  0x13   : > { %v197_v14 = vmul.f32 %v355_v4, %v333_v0  ;;  %v198_v15 = vmul.f32 %v356_v5, %v333_v0  ;;  %v199_v16 = vmul.f32 %v359_v6, %v333_v0  ;;  %v200_v17 = vmul.f32 %v360_v7, %v333_v0 }
  0x14   : > { %v201_v18 = vmul.f32 %v363_v10, %v333_v0  ;;  %v202_v19 = vmul.f32 %v364_v11, %v333_v0  ;;  %v203_v20 = vmul.f32 %v367_v12, %v333_v0  ;;  %v204_v21 = vmul.f32 %v368_v13, %v333_v0 }
  0x15   : > { %v212_v22 = vadd.f32 %v334_v9, %v197_v14  ;;  %v213_v23 = vadd.f32 %v334_v9, %v198_v15  ;;  %v214_v24 = vadd.f32 %v334_v9, %v199_v16  ;;  %v215_v25 = vadd.f32 %v334_v9, %v200_v17 }
  0x16   : > { %v216_v26 = vadd.f32 %v334_v9, %v201_v18  ;;  %v217_v27 = vadd.f32 %v334_v9, %v202_v19  ;;  %v218_v28 = vadd.f32 %v334_v9, %v203_v20  ;;  %v219_v29 = vadd.f32 %v334_v9, %v204_v21 }
  0x17   : > { %v220_v30 = vmax.f32 %v212_v22, 0.0  ;;  %v221_v31 = vmax.f32 %v213_v23, 0.0  ;;  %v222_v32 = vmax.f32 %v214_v24, 0.0  ;;  %v223_v33 = vmax.f32 %v215_v25, 0.0 }
  0x18   : > { %v224_v34 = vmax.f32 %v216_v26, 0.0  ;;  %v225_v35 = vmax.f32 %v217_v27, 0.0  ;;  %v226_v36 = vmax.f32 %v218_v28, 0.0  ;;  %v227_v37 = vmax.f32 %v219_v29, 0.0 }
  0x19   : > { %v372_v38 = vpack.c.bf16 %v221_v31, %v220_v30  ;;  %v377_v39 = vpack.c.bf16 %v223_v33, %v222_v32 }
  0x1a   : > { %v382_v40 = vpack.c.bf16 %v225_v35, %v224_v34  ;;  %v387_v41 = vpack.c.bf16 %v227_v37, %v226_v36 }
  0x1b   : > { %373 = vst [vmem:[%s172_s25] sm:$0xff] %v372_v38   ;;  %392 = vst [vmem:[%s172_s25 + $0x8] sm:$0xff] %v377_v39  }
  0x1c   : > { %393 = vst [vmem:[%s172_s25 + $0x10] sm:$0xff] %v382_v40   ;;  %394 = vst [vmem:[%s172_s25 + $0x18] sm:$0xff] %v387_v41  }
  0x1d PF: > { %s13_s12 = sadd.s32 1, %s409_s12  }
  0x1e   : > { %p10_p4 = scmp.ge.s32.totalorder %s13_s12, 4  }
  0x20   :  { %12 = sbr.rel (!%p10_p4) target bundleno = 1 (0x1), region = 62 }

// kernel: res_block_forward.4
= control target key start
LH: loop header
LB: loop body
LE: loop exit
PB: predicated region body
PF: predicated region fallthrough
CT: control target
= control target key end

     0   :  { %s747_s15 = smov 0   ;;  %s749_s16 = smov 0   ;;  %s813_s0 = inlined_call_operand.vmem [shape: bf16[128,48], index: 0, kind: input, shape index: {}]   ;;  %s814_s1 = inlined_call_operand.vmem [shape: bf16[48,128], index: 1, kind: input, shape index: {}]   ;;  %s815_s2 = inlined_call_operand.vmem [shape: bf16[128,128], index: 2, kind: output, shape index: {0}]   ;;  %s816_s3 = inlined_call_operand.vmem [shape: f32[2,1,128], index: 3, kind: output, shape index: {1}]   ;;  %s817_s4 = inlined_call_operand.vmem [shape: f32[2,1,128], index: 4, kind: output, shape index: {2}]  }
   0x1   :  { %s751_s17 = smov 0  }
   0x2 LB: > { %s27_s18 = sadd.s32 1, %s715_s16  ;;  %p581_p0 = scmp.ge.s32.totalorder %s719_s17, 1  ;;  %s719_s17 = sphi %s751_s17, %s15_s17   ;;  %s715_s16 = sphi %s749_s16, %s819_s16   ;;  %s711_s15 = sphi %s747_s15, %s818_s15  }
   0x3   : > { %p29_p1 = scmp.ge.s32.totalorder %s27_s18, 2  ;;  %p186_p2 = scmp.lt.s32.totalorder %s719_s17, 3 }
   0x5   : > { %s821_s18 = smov (%p29_p1, %s27_s18), 0  ;;  %p187_p3 = pnand %p581_p0, %p186_p2 }
   0x6   : > { %v690_v0 = vld [vmem:[%s814_s1] sm:$0xff] (!%p187_p3)   ;;  %s582_s21 = sshll.u32 (!%p187_p3), %s711_s15, 3  ;;  %v691_v1 = vld [vmem:[%s814_s1 + $0x8] sm:$0xff] (!%p187_p3)   ;;  %v692_v2 = vld [vmem:[%s814_s1 + $0x10] sm:$0xff] (!%p187_p3)   ;;  %vm301_vm0 = vcmask (!%p187_p3), 392192   ;;  %p236_p5 = scmp.lt.s32.totalorder (!%p187_p3), %s711_s15, 1 }
   0x7   : > { %190 = sbr.rel (%p187_p3) target bundleno = 265 (0x109), region = 28  ;;  %p222_p4 = scmp.lt.s32.totalorder (!%p187_p3), %s582_s21, 15  ;;  %645 = vmatprep.subr.bf16.mxu0 (!%p187_p3), %v690_v0  ;;  %659 = vmatprep.subr.bf16.mxu1 (!%p187_p3), %v690_v0  ;;  %v721_v7 = vmov (!%p187_p3), 0.0  }
   0x8   : > { %646 = vmatpush3.bf16.msra.mxu0 (!%p187_p3), %v690_v0  ;;  %662 = vmatpush3.bf16.msra.mxu1 (!%p187_p3), %v690_v0 }
   0x9   : > { %647 = vmatprep.subr.bf16.mxu0 (!%p187_p3), %v691_v1  ;;  %660 = vmatprep.subr.bf16.mxu1 (!%p187_p3), %v691_v1 }
   0xc   : > { %648 = vmatpush3.bf16.msra.mxu0 (!%p187_p3), %v691_v1  ;;  %663 = vmatpush3.bf16.msra.mxu1 (!%p187_p3), %v691_v1 }
   0xd   : > { %649 = vmatprep.subr.bf16.mxu0 (!%p187_p3), %v692_v2  ;;  %661 = vmatprep.subr.bf16.mxu1 (!%p187_p3), %v692_v2 }
   0xe   : > { %s823_s21 = smov (!%p222_p4, %s582_s21), 15  ;;  %s825_s15 = smov (!%p236_p5, %s711_s15), 1 }
   0xf   : > { %s583_s26 = sshll.u32 %s823_s21, 2  ;;  %s788_s6 = scalar_lea.vmem %s816_s3, %s825_s15 }
  0x10   : > { %s225_s29 = scalar_lea.vmem %s813_s0, %s583_s26  ;;  %650 = vmatpush3.bf16.msra.mxu0 %v692_v2  ;;  %664 = vmatpush3.bf16.msra.mxu1 %v692_v2  ;;  %s793_s9 = scalar_lea.vmem %s817_s4, %s825_s15  ;;  %247 = vst [vmem:[%s788_s6] sm:$0x1] %v721_v7 }
  0x11   : > { %v693_v3 = vld [vmem:[%s225_s29] sm:$0xff]   ;;  %v694_v4 = vld [vmem:[%s225_s29 + $0x8] sm:$0xff]   ;;  %v695_v5 = vld [vmem:[%s225_s29 + $0x10] sm:$0xff]   ;;  %248 = vst [vmem:[%s793_s9] sm:$0x1] %v721_v7  ;;  %s233_s12 = scalar_lea.vmem %s815_s2, %s583_s26 }
  0x12   : > { %651 = vmatprep.mubr.msk.bf16.mxu0 %vm301_vm0, %v693_v3  ;;  %v696_v6 = vld [vmem:[%s225_s29 + $0x18] sm:$0xff]   ;;  %655 = vmatprep.mubr.msk.bf16.mxu1 %vm301_vm0, %v695_v5 }
  0x13   : > { %652 = vmatmul.mubr.msk.bf16.vlgmr.msra.gmra.mrb[0].mxu0 %vm301_vm0, %v694_v4  ;;  %656 = vmatmul.mubr.msk.bf16.vlgmr.msra.gmra.mrb[0].mxu1 %vm301_vm0, %v696_v6 }
  0x17   : > { %v419_v51 = vld [vmem:[%s788_s6] sm:$0x1] }
  0x18   : > { %v435_v54 = vld [vmem:[%s793_s9] sm:$0x1] }
  0xe6   : > { %v653_v8 = vpop.f32.mrb[0].mxu0  ;;  %v657_v9 = vpop.f32.mrb[0].mxu1 }
  0xe7   : > { %v348_v10 = vpop.f32.mrb[1].mxu0  ;;  %v364_v11 = vpop.f32.mrb[1].mxu1  ;;  %v438_v23 = vmul.f32 %v653_v8, %v653_v8  ;;  %v442_v35 = vmul.f32 %v657_v9, %v657_v9 }
  0xe8   : > { %v654_v12 = vpop.f32.mrb[2].mxu0  ;;  %v658_v13 = vpop.f32.mrb[2].mxu1  ;;  %v436_v14 = vmul.f32 %v348_v10, %v348_v10  ;;  %v440_v29 = vmul.f32 %v364_v11, %v364_v11 }
  0xe9   : > { %v623_v15 = vpack.c.bf16 %v654_v12, %v653_v8  ;;  %v351_v16 = vpop.f32.mrb[3].mxu0  ;;  %v633_v17 = vpack.c.bf16 %v658_v13, %v657_v9  ;;  %v367_v18 = vpop.f32.mrb[3].mxu1  ;;  %v439_v26 = vmul.f32 %v654_v12, %v654_v12  ;;  %v443_v38 = vmul.f32 %v658_v13, %v658_v13 }
  0xea   : > { %v618_v19 = vpack.c.bf16 %v351_v16, %v348_v10  ;;  %v420_v20 = vadd.f32 %v351_v16, %v348_v10  ;;  %v437_v21 = vmul.f32 %v351_v16, %v351_v16  ;;  %v628_v22 = vpack.c.bf16 %v367_v18, %v364_v11 }
  0xeb   : > { %635 = vst [vmem:[%s233_s12 + $0x8] sm:$0xff] %v623_v15   ;;  %637 = vst [vmem:[%s233_s12 + $0x18] sm:$0xff] %v633_v17   ;;  %v441_v34 = vmul.f32 %v367_v18, %v367_v18 }
  0xec   : > { %619 = vst [vmem:[%s233_s12] sm:$0xff] %v618_v19   ;;  %v421_v24 = vadd.f32 %v653_v8, %v420_v20  ;;  %v444_v25 = vadd.f32 %v437_v21, %v436_v14  ;;  %636 = vst [vmem:[%s233_s12 + $0x10] sm:$0xff] %v628_v22  }
  0xee   : > { %v445_v27 = vadd.f32 %v444_v25, %v438_v23  ;;  %v422_v28 = vadd.f32 %v654_v12, %v421_v24 }
  0xf0   : > { %v423_v30 = vadd.f32 %v422_v28, %v364_v11  ;;  %v446_v31 = vadd.f32 %v445_v27, %v439_v26 }
  0xf2   : > { %v447_v32 = vadd.f32 %v446_v31, %v440_v29  ;;  %v424_v33 = vadd.f32 %v423_v30, %v367_v18 }
  0xf4   : > { %v425_v36 = vadd.f32 %v657_v9, %v424_v33  ;;  %v448_v37 = vadd.f32 %v447_v32, %v441_v34 }
  0xf6   : > { %v426_v39 = vadd.f32 %v658_v13, %v425_v36  ;;  %v449_v40 = vadd.f32 %v448_v37, %v442_v35 }
  0xf8   : > { %v427_v41 = vrot.slane %v426_v39, 4  ;;  %v450_v42 = vadd.f32 %v449_v40, %v443_v38 }
  0xfa   : > { %v428_v43 = vadd.f32 %v427_v41, %v426_v39  ;;  %v451_v44 = vrot.slane %v450_v42, 4 }
  0xfc   : > { %v429_v45 = vrot.slane %v428_v43, 2  ;;  %v452_v46 = vadd.f32 %v451_v44, %v450_v42 }
  0xfe   : > { %v430_v47 = vadd.f32 %v429_v45, %v428_v43  ;;  %v453_v48 = vrot.slane %v452_v46, 2 }
 0x100   : > { %v431_v49 = vrot.slane %v430_v47, 1  ;;  %v454_v50 = vadd.f32 %v453_v48, %v452_v46 }
 0x102   : > { %v432_v52 = vadd.f32 %v431_v49, %v430_v47  ;;  %v455_v53 = vrot.slane %v454_v50, 1 }
 0x104   : > { %v433_v55 = vadd.f32 %v432_v52, %v419_v51  ;;  %v456_v56 = vadd.f32 %v455_v53, %v454_v50 }
 0x106   : > { %434 = vst [vmem:[%s788_s6] sm:$0x1] %v433_v55  ;;  %v457_v57 = vadd.f32 %v456_v56, %v435_v54 }
 0x108   : > { %458 = vst [vmem:[%s793_s9] sm:$0x1] %v457_v57 }
 0x109 PF: > { %s15_s17 = sadd.s32 1, %s719_s17   ;;  %s818_s15 = smov %s715_s16 }
 0x10a   : > { %p12_p6 = scmp.ge.s32.totalorder %s15_s17, 4   ;;  %s819_s16 = smov %s821_s18 }
 0x10c   :  { %14 = sbr.rel (!%p12_p6) target bundleno = 2 (0x2), region = 86 }

// kernel: res_block_forward.6
= control target key start
LH: loop header
LB: loop body
LE: loop exit
PB: predicated region body
PF: predicated region fallthrough
CT: control target
= control target key end

     0   :  { %s777_s15 = smov 0   ;;  %s779_s16 = smov 0   ;;  %s857_s0 = inlined_call_operand.vmem [shape: bf16[128,80], index: 0, kind: input, shape index: {}]   ;;  %s858_s1 = inlined_call_operand.vmem [shape: bf16[80,128], index: 1, kind: input, shape index: {}]   ;;  %s859_s2 = inlined_call_operand.vmem [shape: bf16[128,128], index: 2, kind: output, shape index: {0}]   ;;  %s860_s3 = inlined_call_operand.vmem [shape: f32[2,1,128], index: 3, kind: output, shape index: {1}]   ;;  %s861_s4 = inlined_call_operand.vmem [shape: f32[2,1,128], index: 4, kind: output, shape index: {2}]  }
   0x1   :  { %s781_s17 = smov 0  }
   0x2 LB: > { %s27_s18 = sadd.s32 1, %s745_s16  ;;  %p597_p0 = scmp.ge.s32.totalorder %s749_s17, 1  ;;  %s749_s17 = sphi %s781_s17, %s15_s17   ;;  %s745_s16 = sphi %s779_s16, %s863_s16   ;;  %s741_s15 = sphi %s777_s15, %s862_s15  }
   0x3   : > { %p29_p1 = scmp.ge.s32.totalorder %s27_s18, 2  ;;  %p186_p2 = scmp.lt.s32.totalorder %s749_s17, 3 }
   0x5   : > { %s865_s18 = smov (%p29_p1, %s27_s18), 0  ;;  %p187_p3 = pnand %p597_p0, %p186_p2 }
   0x6   : > { %v718_v0 = vld [vmem:[%s858_s1] sm:$0xff] (!%p187_p3)   ;;  %s598_s21 = sshll.u32 (!%p187_p3), %s741_s15, 3  ;;  %v719_v1 = vld [vmem:[%s858_s1 + $0x8] sm:$0xff] (!%p187_p3)   ;;  %v720_v2 = vld [vmem:[%s858_s1 + $0x10] sm:$0xff] (!%p187_p3)   ;;  %vm317_vm0 = vcmask (!%p187_p3), 654336   ;;  %p236_p5 = scmp.lt.s32.totalorder (!%p187_p3), %s741_s15, 1 }
   0x7   : > { %190 = sbr.rel (%p187_p3) target bundleno = 273 (0x111), region = 28  ;;  %p222_p4 = scmp.lt.s32.totalorder (!%p187_p3), %s598_s21, 15  ;;  %665 = vmatprep.subr.bf16.mxu0 (!%p187_p3), %v718_v0  ;;  %683 = vmatprep.subr.bf16.mxu1 (!%p187_p3), %v718_v0  ;;  %v721_v4 = vld [vmem:[%s858_s1 + $0x18] sm:$0xff] (!%p187_p3)   ;;  %v722_v6 = vld [vmem:[%s858_s1 + $0x20] sm:$0xff] (!%p187_p3)   ;;  %v751_v9 = vmov (!%p187_p3), 0.0  }
   0x8   : > { %666 = vmatpush3.bf16.msra.mxu0 (!%p187_p3), %v718_v0  ;;  %688 = vmatpush3.bf16.msra.mxu1 (!%p187_p3), %v718_v0 }
   0x9   : > { %667 = vmatprep.subr.bf16.mxu0 (!%p187_p3), %v719_v1  ;;  %684 = vmatprep.subr.bf16.mxu1 (!%p187_p3), %v719_v1 }
   0xc   : > { %668 = vmatpush3.bf16.msra.mxu0 (!%p187_p3), %v719_v1  ;;  %689 = vmatpush3.bf16.msra.mxu1 (!%p187_p3), %v719_v1 }
   0xd   : > { %669 = vmatprep.subr.bf16.mxu0 (!%p187_p3), %v720_v2  ;;  %685 = vmatprep.subr.bf16.mxu1 (!%p187_p3), %v720_v2 }
   0xe   : > { %s867_s21 = smov (!%p222_p4, %s598_s21), 15  ;;  %s869_s15 = smov (!%p236_p5, %s741_s15), 1 }
   0xf   : > { %s599_s26 = sshll.u32 %s867_s21, 2  ;;  %s830_s10 = scalar_lea.vmem %s860_s3, %s869_s15 }
  0x10   : > { %s225_s29 = scalar_lea.vmem %s857_s0, %s599_s26  ;;  %670 = vmatpush3.bf16.msra.mxu0 %v720_v2  ;;  %690 = vmatpush3.bf16.msra.mxu1 %v720_v2  ;;  %s835_s13 = scalar_lea.vmem %s861_s4, %s869_s15  ;;  %247 = vst [vmem:[%s830_s10] sm:$0x1] %v751_v9 }
  0x11   : > { %v723_v3 = vld [vmem:[%s225_s29] sm:$0xff]   ;;  %v725_v5 = vld [vmem:[%s225_s29 + $0x10] sm:$0xff]   ;;  %671 = vmatprep.subr.bf16.mxu0 %v721_v4  ;;  %686 = vmatprep.subr.bf16.mxu1 %v721_v4  ;;  %v724_v7 = vld [vmem:[%s225_s29 + $0x8] sm:$0xff]   ;;  %248 = vst [vmem:[%s835_s13] sm:$0x1] %v751_v9  ;;  %s233_s20 = scalar_lea.vmem %s859_s2, %s599_s26 }
  0x12   : > { %675 = vmatprep.mubr.msk.bf16.mxu0 %vm317_vm0, %v723_v3  ;;  %679 = vmatprep.mubr.msk.bf16.mxu1 %vm317_vm0, %v725_v5  ;;  %v726_v8 = vld [vmem:[%s225_s29 + $0x18] sm:$0xff]  }
  0x14   : > { %672 = vmatpush3.bf16.msra.mxu0 %v721_v4  ;;  %691 = vmatpush3.bf16.msra.mxu1 %v721_v4 }
  0x15   : > { %673 = vmatprep.subr.bf16.mxu0 %v722_v6  ;;  %687 = vmatprep.subr.bf16.mxu1 %v722_v6 }
  0x17   : > { %v435_v53 = vld [vmem:[%s830_s10] sm:$0x1] }
  0x18   : > { %674 = vmatpush3.bf16.msra.mxu0 %v722_v6  ;;  %692 = vmatpush3.bf16.msra.mxu1 %v722_v6  ;;  %v451_v56 = vld [vmem:[%s835_s13] sm:$0x1] }
  0x1b   : > { %676 = vmatmul.mubr.msk.bf16.vlgmr.msra.gmra.mrb[0].mxu0 %vm317_vm0, %v724_v7  ;;  %680 = vmatmul.mubr.msk.bf16.vlgmr.msra.gmra.mrb[0].mxu1 %vm317_vm0, %v726_v8 }
  0xee   : > { %v677_v10 = vpop.f32.mrb[0].mxu0  ;;  %v681_v11 = vpop.f32.mrb[0].mxu1 }
  0xef   : > { %v364_v12 = vpop.f32.mrb[1].mxu0  ;;  %v380_v13 = vpop.f32.mrb[1].mxu1  ;;  %v454_v25 = vmul.f32 %v677_v10, %v677_v10  ;;  %v458_v37 = vmul.f32 %v681_v11, %v681_v11 }
  0xf0   : > { %v678_v14 = vpop.f32.mrb[2].mxu0  ;;  %v682_v15 = vpop.f32.mrb[2].mxu1  ;;  %v452_v16 = vmul.f32 %v364_v12, %v364_v12  ;;  %v456_v31 = vmul.f32 %v380_v13, %v380_v13 }
  0xf1   : > { %v641_v17 = vpack.c.bf16 %v678_v14, %v677_v10  ;;  %v367_v18 = vpop.f32.mrb[3].mxu0  ;;  %v651_v19 = vpack.c.bf16 %v682_v15, %v681_v11  ;;  %v383_v20 = vpop.f32.mrb[3].mxu1  ;;  %v455_v28 = vmul.f32 %v678_v14, %v678_v14  ;;  %v459_v40 = vmul.f32 %v682_v15, %v682_v15 }
  0xf2   : > { %v636_v21 = vpack.c.bf16 %v367_v18, %v364_v12  ;;  %v436_v22 = vadd.f32 %v367_v18, %v364_v12  ;;  %v453_v23 = vmul.f32 %v367_v18, %v367_v18  ;;  %v646_v24 = vpack.c.bf16 %v383_v20, %v380_v13 }
  0xf3   : > { %653 = vst [vmem:[%s233_s20 + $0x8] sm:$0xff] %v641_v17   ;;  %655 = vst [vmem:[%s233_s20 + $0x18] sm:$0xff] %v651_v19   ;;  %v457_v36 = vmul.f32 %v383_v20, %v383_v20 }
  0xf4   : > { %637 = vst [vmem:[%s233_s20] sm:$0xff] %v636_v21   ;;  %v437_v26 = vadd.f32 %v677_v10, %v436_v22  ;;  %v460_v27 = vadd.f32 %v453_v23, %v452_v16  ;;  %654 = vst [vmem:[%s233_s20 + $0x10] sm:$0xff] %v646_v24  }
  0xf6   : > { %v461_v29 = vadd.f32 %v460_v27, %v454_v25  ;;  %v438_v30 = vadd.f32 %v678_v14, %v437_v26 }
  0xf8   : > { %v439_v32 = vadd.f32 %v438_v30, %v380_v13  ;;  %v462_v33 = vadd.f32 %v461_v29, %v455_v28 }
  0xfa   : > { %v463_v34 = vadd.f32 %v462_v33, %v456_v31  ;;  %v440_v35 = vadd.f32 %v439_v32, %v383_v20 }
  0xfc   : > { %v441_v38 = vadd.f32 %v681_v11, %v440_v35  ;;  %v464_v39 = vadd.f32 %v463_v34, %v457_v36 }
  0xfe   : > { %v442_v41 = vadd.f32 %v682_v15, %v441_v38  ;;  %v465_v42 = vadd.f32 %v464_v39, %v458_v37 }
 0x100   : > { %v443_v43 = vrot.slane %v442_v41, 4  ;;  %v466_v44 = vadd.f32 %v465_v42, %v459_v40 }
 0x102   : > { %v444_v45 = vadd.f32 %v443_v43, %v442_v41  ;;  %v467_v46 = vrot.slane %v466_v44, 4 }
 0x104   : > { %v445_v47 = vrot.slane %v444_v45, 2  ;;  %v468_v48 = vadd.f32 %v467_v46, %v466_v44 }
 0x106   : > { %v446_v49 = vadd.f32 %v445_v47, %v444_v45  ;;  %v469_v50 = vrot.slane %v468_v48, 2 }
 0x108   : > { %v447_v51 = vrot.slane %v446_v49, 1  ;;  %v470_v52 = vadd.f32 %v469_v50, %v468_v48 }
 0x10a   : > { %v448_v54 = vadd.f32 %v447_v51, %v446_v49  ;;  %v471_v55 = vrot.slane %v470_v52, 1 }
 0x10c   : > { %v449_v57 = vadd.f32 %v448_v54, %v435_v53  ;;  %v472_v58 = vadd.f32 %v471_v55, %v470_v52 }
 0x10e   : > { %450 = vst [vmem:[%s830_s10] sm:$0x1] %v449_v57  ;;  %v473_v59 = vadd.f32 %v472_v58, %v451_v56 }
 0x110   : > { %474 = vst [vmem:[%s835_s13] sm:$0x1] %v473_v59 }
 0x111 PF: > { %s15_s17 = sadd.s32 1, %s749_s17   ;;  %s862_s15 = smov %s745_s16 }
 0x112   : > { %p12_p6 = scmp.ge.s32.totalorder %s15_s17, 4   ;;  %s863_s16 = smov %s865_s18 }
 0x114   :  { %14 = sbr.rel (!%p12_p6) target bundleno = 2 (0x2), region = 86 }

// kernel: res_block_forward.7
= control target key start
LH: loop header
LB: loop body
LE: loop exit
PB: predicated region body
PF: predicated region fallthrough
CT: control target
= control target key end

     0   :  { %s488_s15 = smov 0   ;;  %s554_s0 = inlined_call_operand.vmem [shape: bf16[128,128], index: 0, kind: input, shape index: {}]   ;;  %s555_s1 = inlined_call_operand.vmem [shape: f32[1,128], index: 1, kind: input, shape index: {}]   ;;  %s556_s2 = inlined_call_operand.vmem [shape: f32[1,128], index: 2, kind: input, shape index: {}]   ;;  %s557_s3 = inlined_call_operand.vmem [shape: bf16[128,4], index: 3, kind: input, shape index: {}]   ;;  %s558_s4 = inlined_call_operand.vmem [shape: f32[128,128], index: 4, kind: output, shape index: {}]  }
   0x1 LB: > { %s394_s16 = sadd.s32 4294967295, %s461_s15   ;;  %p398_p0 = scmp.ge.s32.totalorder %s461_s15, 1  ;;  %s461_s15 = sphi %s488_s15, %s14_s15  }
   0x2   : > { %p174_p1 = scmp.lt.s32.totalorder %s461_s15, 3 }
   0x4   : > { %p175_p2 = pnand %p398_p0, %p174_p1 }
   0x5   : > { %s399_s17 = sshll.u32 (!%p175_p2), %s394_s16, 3  ;;  %v508_v0 = vld [vmem:[%s555_s1] ss:$0 sm:$0xff] (!%p175_p2)  ;;  %vm317_vm0 = vcmask (!%p175_p2), 31744  }
   0x6   : > { %178 = sbr.rel (%p175_p2) target bundleno = 37 (0x25), region = 36  ;;  %p206_p3 = scmp.lt.s32.totalorder (!%p175_p2), %s399_s17, 15  ;;  %v406_v11 = vld [vmem:[%s556_s2] ss:$0 sm:$0xff] (!%p175_p2) }
   0xd   : > { %s560_s17 = smov (!%p206_p3, %s399_s17), 15 }
   0xe   : > { %s400_s18 = sshll.u32 %s560_s17, 2  ;;  %s404_s29 = sshll.u32 %s560_s17, 3 }
   0xf   : > { %s209_s21 = scalar_lea.vmem %s554_s0, %s400_s18  ;;  %s215_s24 = scalar_lea.vmem %s557_s3, %s400_s18 }
  0x10   : > { %v410_v1 = vld [vmem:[%s209_s21] sm:$0xff]   ;;  %v441_v3 = vld [vmem:[%s209_s21 + $0x8] sm:$0xff]   ;;  %v442_v9 = vld [vmem:[%s209_s21 + $0x10] sm:$0xff]   ;;  %s522_s6 = scalar_lea.vmem %s558_s4, %s404_s29 }
  0x11   : > { %v426_v2 = vld [vmem:[%s215_s24] sm:$0xff]   ;;  %v411_v4 = vunpack.c.l.bf16 %v410_v1  ;;  %v412_v6 = vunpack.c.h.bf16 %v410_v1  ;;  %v444_v8 = vld [vmem:[%s215_s24 + $0x8] sm:$0xff]   ;;  %v445_v10 = vld [vmem:[%s215_s24 + $0x10] sm:$0xff]   ;;  %v415_v12 = vunpack.c.l.bf16 %v441_v3  ;;  %v416_v14 = vunpack.c.h.bf16 %v441_v3 }
  0x12   : > { %v427_v5 = vunpack.c.l.bf16 %v426_v2  ;;  %v428_v7 = vunpack.c.h.bf16 %v426_v2  ;;  %v431_v13 = vunpack.c.l.bf16 %v444_v8  ;;  %v432_v15 = vunpack.c.h.bf16 %v444_v8  ;;  %v443_v16 = vld [vmem:[%s209_s21 + $0x18] sm:$0xff]  }
  0x13   : > { %v246_v17 = vmul.f32 %v411_v4, %v508_v0  ;;  %v247_v18 = vmul.f32 %v412_v6, %v508_v0  ;;  %v419_v19 = vunpack.c.l.bf16 %v442_v9  ;;  %v435_v20 = vunpack.c.l.bf16 %v445_v10  ;;  %v446_v21 = vld [vmem:[%s215_s24 + $0x18] sm:$0xff]  }
  0x14   : > { %v248_v22 = vmul.f32 %v415_v12, %v508_v0  ;;  %v249_v23 = vmul.f32 %v416_v14, %v508_v0  ;;  %v420_v24 = vunpack.c.h.bf16 %v442_v9  ;;  %v436_v25 = vunpack.c.h.bf16 %v445_v10 }
  0x15   : > { %v261_v26 = vadd.f32 %v406_v11, %v246_v17  ;;  %v262_v27 = vadd.f32 %v406_v11, %v247_v18  ;;  %v250_v28 = vmul.f32 %v419_v19, %v508_v0  ;;  %v423_v29 = vunpack.c.l.bf16 %v443_v16 }
  0x16   : > { %v263_v30 = vadd.f32 %v406_v11, %v248_v22  ;;  %v264_v31 = vadd.f32 %v406_v11, %v249_v23  ;;  %v251_v32 = vmul.f32 %v420_v24, %v508_v0  ;;  %v439_v33 = vunpack.c.l.bf16 %v446_v21 }
  0x17   : > { %v285_v34 = vmax.f32 %v261_v26, 0.0  ;;  %v301_v35 = vadd.f32 %v427_v5, %v261_v26  ;;  %v286_v36 = vmax.f32 %v262_v27, 0.0  ;;  %v302_v37 = vadd.f32 %v428_v7, %v262_v27 }
  0x18   : > { %v287_v38 = vmax.f32 %v263_v30, 0.0  ;;  %v303_v39 = vadd.f32 %v431_v13, %v263_v30  ;;  %v288_v40 = vmax.f32 %v264_v31, 0.0  ;;  %v304_v41 = vadd.f32 %v432_v15, %v264_v31 }
  0x19   : > { %293 = vst [vmem:[%s522_s6] sm:$0xff] %v285_v34  ;;  %v309_v42 = vmax.f32 %v301_v35, 0.0  ;;  %294 = vst [vmem:[%s522_s6 + $0x8] sm:$0xff] %v286_v36  ;;  %v310_v43 = vmax.f32 %v302_v37, 0.0  ;;  %v265_v44 = vadd.f32 %v406_v11, %v250_v28  ;;  %v266_v45 = vadd.f32 %v406_v11, %v251_v32 }
  0x1a   : > { %295 = vst [vmem:[%s522_s6 + $0x10] sm:$0xff] %v287_v38  ;;  %v311_v46 = vmax.f32 %v303_v39, 0.0  ;;  %296 = vst [vmem:[%s522_s6 + $0x18] sm:$0xff] %v288_v40  ;;  %v312_v47 = vmax.f32 %v304_v41, 0.0  ;;  %v252_v48 = vmul.f32 %v423_v29, %v508_v0  ;;  %v424_v49 = vunpack.c.h.bf16 %v443_v16 }
  0x1b   : > { %v289_v50 = vmax.f32 %v265_v44, 0.0  ;;  %v305_v51 = vadd.f32 %v435_v20, %v265_v44  ;;  %v290_v52 = vmax.f32 %v266_v45, 0.0  ;;  %v306_v53 = vadd.f32 %v436_v25, %v266_v45  ;;  %318 = vst.msk [vmem:[%s522_s6] sm:$0xff] %vm317_vm0, %v309_v42  ;;  %319 = vst.msk [vmem:[%s522_s6 + $0x8] sm:$0xff] %vm317_vm0, %v310_v43 }
  0x1c   : > { %v267_v54 = vadd.f32 %v406_v11, %v252_v48  ;;  %v253_v55 = vmul.f32 %v424_v49, %v508_v0  ;;  %v440_v56 = vunpack.c.h.bf16 %v446_v21  ;;  %320 = vst.msk [vmem:[%s522_s6 + $0x10] sm:$0xff] %vm317_vm0, %v311_v46  ;;  %321 = vst.msk [vmem:[%s522_s6 + $0x18] sm:$0xff] %vm317_vm0, %v312_v47 }
  0x1d   : > { %297 = vst [vmem:[%s522_s6 + $0x20] sm:$0xff] %v289_v50  ;;  %v313_v57 = vmax.f32 %v305_v51, 0.0  ;;  %298 = vst [vmem:[%s522_s6 + $0x28] sm:$0xff] %v290_v52  ;;  %v314_v58 = vmax.f32 %v306_v53, 0.0 }
  0x1e   : > { %v291_v59 = vmax.f32 %v267_v54, 0.0  ;;  %v307_v60 = vadd.f32 %v439_v33, %v267_v54  ;;  %v268_v61 = vadd.f32 %v406_v11, %v253_v55 }
  0x1f   : > { %322 = vst.msk [vmem:[%s522_s6 + $0x20] sm:$0xff] %vm317_vm0, %v313_v57  ;;  %323 = vst.msk [vmem:[%s522_s6 + $0x28] sm:$0xff] %vm317_vm0, %v314_v58 }
  0x20   : > { %299 = vst [vmem:[%s522_s6 + $0x30] sm:$0xff] %v291_v59  ;;  %v315_v62 = vmax.f32 %v307_v60, 0.0  ;;  %v292_v63 = vmax.f32 %v268_v61, 0.0  ;;  %v308_v0 = vadd.f32 %v440_v56, %v268_v61 }
  0x22   : > { %300 = vst [vmem:[%s522_s6 + $0x38] sm:$0xff] %v292_v63  ;;  %v316_v1 = vmax.f32 %v308_v0, 0.0  ;;  %324 = vst.msk [vmem:[%s522_s6 + $0x30] sm:$0xff] %vm317_vm0, %v315_v62 }
  0x24   : > { %325 = vst.msk [vmem:[%s522_s6 + $0x38] sm:$0xff] %vm317_vm0, %v316_v1 }
  0x25 PF: > { %s14_s15 = sadd.s32 1, %s461_s15  }
  0x26   : > { %p11_p4 = scmp.ge.s32.totalorder %s14_s15, 4  }
  0x28   :  { %13 = sbr.rel (!%p11_p4) target bundleno = 1 (0x1), region = 69 }

</bundles_post_ra>
